<compile_context>
chip_gen: v6e
topology: v6e:2x2x1
jax: 0.10.0
libtpu: 0.0.40
codegen_flags: <defaults>
</compile_context>

<pallas_src>
import math

import jax
import jax.numpy as jnp
from jax.experimental import pallas as pl
from jax.experimental.pallas import tpu as pltpu

# ConstantCoalescent __init__ defaults (deterministic, no checkpoint load)
MU_0 = -0.0049
SIGMA_0 = 2.148
LOG_POP_SIZE_OFFSET = 0.0

_NEG_HALF_LOG_2PI = -0.5 * math.log(2.0 * math.pi)
_NEG_HALF_LOG_SIGMA2 = -0.5 * math.log(SIGMA_0 ** 2)
_INV_SIGMA2 = 1.0 / (SIGMA_0 ** 2)


def _round_up(x, m):
    return ((x + m - 1) // m) * m


def _constant_coalescent_fwd_kernel(et_ref, dcf_ref, side_ref, out_ref):
    et = et_ref[...]                                  # (tb, Npad) f32, event times 0..N-1 (+0-pad)
    dcf = dcf_ref[...].astype(jnp.float32)            # (tb, Npad) cf-difference (0 in padding)
    side = side_ref[...]                              # (tb, 3): [count, tail, log_pop_size]
    count = side[:, 0:1]
    tail = side[:, 1:2]
    lps = side[:, 2:3]

    # sum(intervals * cf) rearranged; padding lanes contribute 0 because dcf==0 there.
    icf_sum = jnp.sum(et * dcf, axis=-1, keepdims=True) + tail        # (tb, 1)

    # loglikelihood: multiply by exp(-lps) instead of dividing by exp(lps)  (EUP op)
    loglik = -lps * count - icf_sum * jnp.exp(-lps)

    # logprior (log_pop_size trailing dim is 1, so the sum over dim=-1 is the value itself)
    logprior = (_NEG_HALF_LOG_2PI + _NEG_HALF_LOG_SIGMA2
                - 0.5 * (lps - MU_0) ** 2 * _INV_SIGMA2)

    prior = loglik + logprior
    # merged output: [:, 0] = log_coalescent_prior, [:, 1] = monitor (prior - lps)
    out_ref[...] = jnp.concatenate([prior, prior - lps], axis=-1)


def _choose_block_b(B, n_pad, dcf_bytes):
    """Batch tile: fill a 32 MiB double-buffered VMEM budget, but keep >=2 parallel
    blocks for v7x's two TensorCores whenever B is large enough to split."""
    per_row = 2 * ((4 + dcf_bytes) * n_pad + 4 * 3 + 4 * 2)   # double-buffered in + out bytes/row
    budget = 32 * 1024 * 1024                                 # v7x-safe (64 MiB physical / TC)
    # sublane alignment per dtype packing (int8 packs 4 rows/sublane, bf16 packs 2)
    align = {1: 32, 2: 16}.get(dcf_bytes, 8)
    tb_budget = max(align, (budget // max(per_row, 1)) // align * align)
    tb_split = _round_up(pl.cdiv(B, 2), align)                # aim for >= 2 grid blocks
    tb = min(tb_budget, tb_split)
    if tb >= B:
        return B                                              # single block == full dim (legal)
    return tb


def constant_coalescent_forward(log_pop_size, event_time_pad, dcf_pad,
                                coalescent_count, tail, block_b=None):
    """Pallas-backed ConstantCoalescent.forward(log_pop_size, monitor_prior=True).

    event_time_pad: (B, Npad) f32 event times et[0..N-1] zero-padded to Npad (128-multiple)
    dcf_pad:        (B, Npad) cf-differences (int8/bf16/f32), zero in the padding lanes
    coalescent_count, tail: (B,) per-row scalars (tail = -et[N]*cf[N-1])
    Returns (log_coalescent_prior, monitor), each of shape (B,), matching PyTorch.
    """
    B, Npad = event_time_pad.shape
    assert Npad % 128 == 0
    assert dcf_pad.shape == (B, Npad)

    lps = jnp.asarray(log_pop_size, jnp.float32).reshape(B, 1)
    side = jnp.concatenate(
        [jnp.asarray(coalescent_count, jnp.float32).reshape(B, 1),
         jnp.asarray(tail, jnp.float32).reshape(B, 1),
         lps], axis=-1)                                       # (B, 3)

    dcf_bytes = jnp.dtype(dcf_pad.dtype).itemsize
    tb = block_b if block_b is not None else _choose_block_b(B, Npad, dcf_bytes)
    grid = (pl.cdiv(B, tb),)

    cost = pl.CostEstimate(
        flops=int(B * (2 * Npad + 16)),
        transcendentals=int(B),
        bytes_accessed=int(B * ((4 + dcf_bytes) * Npad + 4 * 3 + 4 * 2)),
    )

    out = pl.pallas_call(
        _constant_coalescent_fwd_kernel,
        out_shape=jax.ShapeDtypeStruct((B, 2), jnp.float32),
        grid_spec=pltpu.PrefetchScalarGridSpec(
            num_scalar_prefetch=0,
            grid=grid,
            in_specs=[
                pl.BlockSpec((tb, Npad), lambda i: (i, 0)),   # event_time (lane-aligned)
                pl.BlockSpec((tb, Npad), lambda i: (i, 0)),   # dcf (narrow dtype)
                pl.BlockSpec((tb, 3), lambda i: (i, 0)),      # merged side scalars
            ],
            out_specs=pl.BlockSpec((tb, 2), lambda i: (i, 0)),
        ),
        compiler_params=pltpu.CompilerParams(
            dimension_semantics=("parallel",),                # pure data-parallel batch axis
            vmem_limit_bytes=48 * 1024 * 1024,                # < 64 MiB physical on v7x
        ),
        cost_estimate=cost,
    )(event_time_pad, dcf_pad, side)

    return out[:, 0], out[:, 1]


def get_batch_coalescent_info(height, event_info):
    """Plain-JAX glue replicating BaseCoalescent.get_batch_coalescent_info + update_batch,
    restructured into the lane-aligned kernel operands.

    Returns (event_time_pad (B,Npad) f32, dcf_pad (B,Npad) narrow, coalescent_count (B,),
    tail (B,)).
    """
    # TODO(synk): the descending sort / gather / cumsum bookkeeping has no clean
    # Pallas equivalent and stays in plain JAX (XLA sort).
    B, n_nodes = height.shape
    N = n_nodes - 1
    ntips = (n_nodes + 1) // 2

    order = jnp.argsort(-height, axis=-1)
    event_time = jnp.take_along_axis(height, order, axis=-1).astype(jnp.float32)   # (B, N+1)
    ev = jnp.take_along_axis(event_info, order, axis=-1)[:, :-1]                   # (B, N)
    lineages = 1.0 + jnp.cumsum(ev, axis=-1)                                       # (B, N)
    coalescent_count = jnp.sum(ev == 1, axis=-1).astype(jnp.float32)               # (B,)

    cf = lineages * (lineages - 1.0) * 0.5                       # exact small ints in f32
    dcf = cf - jnp.concatenate(
        [jnp.zeros((B, 1), cf.dtype), cf[:, :-1]], axis=-1)      # dcf[j] = cf[j]-cf[j-1]
    tail = -event_time[:, -1] * cf[:, -1]                        # -et[N] * cf[N-1]

    # |dcf| <= ntips (lineage counts bounded by #tips) -> narrow-but-exact dtype.
    if ntips <= 127:
        dcf = dcf.astype(jnp.int8)
    elif ntips <= 256:
        dcf = dcf.astype(jnp.bfloat16)
    else:
        dcf = dcf.astype(jnp.float32)

    Npad = _round_up(max(N, 1), 128)
    et_main = event_time[:, :N]
    if Npad > N:
        pad = ((0, 0), (0, Npad - N))
        et_main = jnp.pad(et_main, pad)
        dcf = jnp.pad(dcf, pad)          # zero dcf in padding -> zero contribution
    return et_main, dcf, coalescent_count, tail


if __name__ == "__main__":
    key = jax.random.PRNGKey(0)
    k_h, k_eps = jax.random.split(key)

    # Small synthetic rooted trees: B particles, ntips leaves each.
    B = 64
    ntips = 65                       # -> 2*ntips-1 = 129 node heights, N = 128 intervals
    tip_heights = jnp.zeros((B, ntips), jnp.float32)
    internal_heights = jax.random.uniform(k_h, (B, ntips - 1),
                                          minval=0.1, maxval=5.0,
                                          dtype=jnp.float32)
    height = jnp.concatenate([tip_heights, internal_heights], axis=-1)   # (B, 129)
    # event_info: +1 at coalescent (internal) events, -1 at sampling (tip) events
    event_info = jnp.concatenate(
        [-jnp.ones((B, ntips), jnp.float32), jnp.ones((B, ntips - 1), jnp.float32)],
        axis=-1)

    et_pad, dcf_pad, coalescent_count, tail = get_batch_coalescent_info(height, event_info)

    # Parameters from __init__: pop_size_param = zeros(2, 1)
    pop_size_param = jnp.zeros((2, 1), jnp.float32)
    mean = pop_size_param[0] + LOG_POP_SIZE_OFFSET       # (1,)
    std = pop_size_param[1]                              # (1,)
    eps = jax.random.normal(k_eps, (B, 1), jnp.float32)
    log_pop_size = mean + jnp.exp(std) * eps             # (B, 1)  (sample_pop_size reparam)

    # Auto tile choice -> 2 blocks of 32 rows here (exercises the tiled parallel grid).
    prior, monitor = constant_coalescent_forward(
        log_pop_size, et_pad, dcf_pad, coalescent_count, tail)
    jax.block_until_ready((prior, monitor))

    # Plain-JAX reference check of the original (PyTorch) forward semantics
    order = jnp.argsort(-height, axis=-1)
    event_time = jnp.take_along_axis(height, order, axis=-1)
    ev = jnp.take_along_axis(event_info, order, axis=-1)[:, :-1]
    lineages = 1.0 + jnp.cumsum(ev, axis=-1)
    intervals = event_time[:, :-1] - event_time[:, 1:]
    cf = lineages * (lineages - 1.0) / 2.0
    count_ref = jnp.sum(ev == 1, axis=-1).astype(jnp.float32)
    lps = log_pop_size[:, 0]
    ref_ll = -lps * count_ref - jnp.sum(intervals * cf, axis=-1) / jnp.exp(lps)
    ref_lp = (-0.5 * math.log(2.0 * math.pi)
              - 0.5 * math.log(SIGMA_0 ** 2)
              - 0.5 * (lps - MU_0) ** 2 / (SIGMA_0 ** 2))
    ref_prior = ref_ll + ref_lp
    assert jnp.allclose(prior, ref_prior, rtol=1e-5, atol=1e-4)
    assert jnp.allclose(monitor, ref_prior - lps, rtol=1e-5, atol=1e-4)

    print("KERNEL_OK")
</pallas_src>

<mosaic_0001>
module attributes {stable_mosaic.version = 11 : i64} {
  func.func @_constant_coalescent_fwd_kernel(%arg0: i32, %arg1: memref<32x128xf32, #tpu.memory_space<vmem>>, %arg2: memref<32x128xi8, #tpu.memory_space<vmem>>, %arg3: memref<32x3xf32, #tpu.memory_space<vmem>>, %arg4: memref<32x2xf32, #tpu.memory_space<vmem>>) attributes {dimension_semantics = [#tpu.dimension_semantics<parallel>], iteration_bounds = array<i64: 2>, scalar_prefetch = 0 : i64, scratch_operands = 0 : i64, tpu.core_type = #tpu.core_type<tc>, window_params = [{transform_indices = @transform_0, window_bounds = array<i64: 32, 128>}, {transform_indices = @transform_1, window_bounds = array<i64: 32, 128>}, {transform_indices = @transform_2, window_bounds = array<i64: 32, 3>}, {transform_indices = @transform_3, window_bounds = array<i64: 32, 2>}]} {
    %c0 = arith.constant 0 : index
    %c0_0 = arith.constant 0 : index
    %0 = vector.load %arg1[%c0, %c0_0] : memref<32x128xf32, #tpu.memory_space<vmem>>, vector<32x128xf32>
    %c0_1 = arith.constant 0 : index
    %c0_2 = arith.constant 0 : index
    %1 = vector.load %arg2[%c0_1, %c0_2] : memref<32x128xi8, #tpu.memory_space<vmem>>, vector<32x128xi8>
    %2 = arith.sitofp %1 : vector<32x128xi8> to vector<32x128xf32>
    %c0_3 = arith.constant 0 : index
    %c0_4 = arith.constant 0 : index
    %3 = vector.load %arg3[%c0_3, %c0_4] : memref<32x3xf32, #tpu.memory_space<vmem>>, vector<32x3xf32>
    %4 = vector.extract_strided_slice %3 {offsets = [0, 0], sizes = [32, 1], strides = [1, 1]} : vector<32x3xf32> to vector<32x1xf32>
    %5 = vector.extract_strided_slice %3 {offsets = [0, 1], sizes = [32, 1], strides = [1, 1]} : vector<32x3xf32> to vector<32x1xf32>
    %6 = vector.extract_strided_slice %3 {offsets = [0, 2], sizes = [32, 1], strides = [1, 1]} : vector<32x3xf32> to vector<32x1xf32>
    %7 = arith.mulf %0, %2 : vector<32x128xf32>
    %cst = arith.constant dense<0.000000e+00> : vector<32xf32>
    %8 = vector.multi_reduction <add>, %7, %cst [1] : vector<32x128xf32> to vector<32xf32>
    %9 = vector.shape_cast %8 : vector<32xf32> to vector<32x1xf32>
    %10 = arith.addf %9, %5 : vector<32x1xf32>
    %cst_5 = arith.constant 0.000000e+00 : f32
    %11 = vector.broadcast %cst_5 : f32 to vector<32x1xf32>
    %12 = arith.subf %11, %6 : vector<32x1xf32>
    %13 = arith.mulf %12, %4 : vector<32x1xf32>
    %cst_6 = arith.constant 0.000000e+00 : f32
    %14 = vector.broadcast %cst_6 : f32 to vector<32x1xf32>
    %15 = arith.subf %14, %6 : vector<32x1xf32>
    %16 = math.exp %15 : vector<32x1xf32>
    %17 = arith.mulf %10, %16 : vector<32x1xf32>
    %18 = arith.subf %13, %17 : vector<32x1xf32>
    %cst_7 = arith.constant -4.900000e-03 : f32
    %19 = vector.broadcast %cst_7 : f32 to vector<32x1xf32>
    %20 = arith.subf %6, %19 : vector<32x1xf32>
    %21 = arith.mulf %20, %20 : vector<32x1xf32>
    %cst_8 = arith.constant 5.000000e-01 : f32
    %22 = vector.broadcast %cst_8 : f32 to vector<32x1xf32>
    %23 = arith.mulf %22, %21 : vector<32x1xf32>
    %cst_9 = arith.constant 0.216736197 : f32
    %24 = vector.broadcast %cst_9 : f32 to vector<32x1xf32>
    %25 = arith.mulf %23, %24 : vector<32x1xf32>
    %cst_10 = arith.constant -1.68347573 : f32
    %26 = vector.broadcast %cst_10 : f32 to vector<32x1xf32>
    %27 = arith.subf %26, %25 : vector<32x1xf32>
    %28 = arith.addf %18, %27 : vector<32x1xf32>
    %29 = arith.subf %28, %6 : vector<32x1xf32>
    %30 = tpu.concatenate %28, %29 in 1 : vector<32x1xf32>, vector<32x1xf32> -> vector<32x2xf32>
    %c0_11 = arith.constant 0 : index
    %c0_12 = arith.constant 0 : index
    %31 = vector.load %arg4[%c0_11, %c0_12] : memref<32x2xf32, #tpu.memory_space<vmem>>, vector<32x2xf32>
    tpu.vector_store %arg4[%c0_11, %c0_12], %30 {strides = array<i32>} : memref<32x2xf32, #tpu.memory_space<vmem>>, vector<32x2xf32>,
    return
  }
  func.func @transform_0(%arg0: i32) -> (i32, i32) {
    %c0_i32 = arith.constant 0 : i32
    %c0_i32_0 = arith.constant 0 : i32
    return %arg0, %c0_i32 : i32, i32
  }
  func.func @transform_1(%arg0: i32) -> (i32, i32) {
    %c0_i32 = arith.constant 0 : i32
    %c0_i32_0 = arith.constant 0 : i32
    return %arg0, %c0_i32 : i32, i32
  }
  func.func @transform_2(%arg0: i32) -> (i32, i32) {
    %c0_i32 = arith.constant 0 : i32
    %c0_i32_0 = arith.constant 0 : i32
    return %arg0, %c0_i32 : i32, i32
  }
  func.func @transform_3(%arg0: i32) -> (i32, i32) {
    %c0_i32 = arith.constant 0 : i32
    %c0_i32_0 = arith.constant 0 : i32
    return %arg0, %c0_i32 : i32, i32
  }
}

</mosaic_0001>

<bundles_post_ra>
// kernel: tpu_custom_call.1
= control target key start
LH: loop header
LB: loop body
LE: loop exit
PB: predicated region body
PF: predicated region fallthrough
CT: control target
= control target key end

     0   :  { %8 = vsyncpa [#allocation3], 0  ;;  %s821_s0 = inlined_call_operand.vmem [shape: f32[64,128], index: 0, kind: input, shape index: {}]   ;;  %s822_s1 = inlined_call_operand.hbm [shape: s8[64,128], index: 1, kind: input, shape index: {}]   ;;  %s823_s2 = inlined_call_operand.vmem [shape: f32[64,3], index: 2, kind: input, shape index: {}]   ;;  %s824_s3 = inlined_call_operand.vmem [shape: f32[64,2], index: 3, kind: output, shape index: {}]  }
   0x1   :  { %10 = vsyncpa [#allocation3 + $0x1], 0  ;;  %s659_s12 = smov 0   ;;  %s661_s13 = smov 0  }
   0x2   :  { %s663_s14 = smov 0   ;;  %s665_s15 = smov 0  }
   0x3 LB: > { %s499_s16 = sadd.s32 4294967295, %s632_s15   ;;  %s679_s17 = sadd.s32 1, %s632_s15   ;;  %s632_s15 = sphi %s665_s15, %s834_s15   ;;  %s628_s14 = sphi %s663_s14, %s833_s14   ;;  %s624_s13 = sphi %s661_s13, %s832_s13   ;;  %s620_s12 = sphi %s659_s12, %s831_s12  }
   0x4   : > { %s46_s18 = ssub.s32 %s632_s15, %s679_s17  ;;  %s49_s19 = sadd.s32 1, %s628_s14 }
   0x5   : > { %p47_p0 = scmp.eq.s32.totalorder %s46_s18, 0  ;;  %p56_p1 = scmp.ne.s32.totalorder %s628_s14, %s624_s13 }
   0x6   : > { %p57_p2 = scmp.eq.s32.totalorder %s632_s15, 0  ;;  %p62_p3 = scmp.ne.s32.totalorder %s624_s13, %s620_s12 }
   0x7   : > { %s689_s20 = scalar_select %p47_p0, %s628_s14, %s49_s19  }
   0x8   : > { %p58_p4 = por %p57_p2, %p56_p1  ;;  %p63_p5 = scmp.eq.s32.totalorder %s499_s16, 0 }
   0x9   : > { %p525_p6 = scmp.lt.s32.totalorder %s632_s15, 2  ;;  %s147_s22 = sand.u32 1, %s628_s14  }
   0xa   : > { %p694_p7 = por %p63_p5, %p62_p3  ;;  %s503_s23 = sshll.u32 %s147_s22, 3 }
   0xb   : > { %s504_s24 = sshll.u32 %s632_s15, 7  ;;  %s151_s28 = scalar_lea.vmem [#allocation2], %s503_s23 }
   0xc   : > { %s826_s21 = scalar_select %p694_p7, 1, 0 }
   0xd   : > { %s703_s27 = scalar_lea.hbm %s822_s1, %s504_s24  ;;  %s158_s29 = sshll.u32 %s151_s28, 4  ;;  %s705_s29 = int_to_ptr.vmem [resolvable:$true] %s158_s29 }
   0xe   : > { %p707_p8 = pnand %p525_p6, %p58_p4  ;;  %s148_s4 = scalar_lea.sflag [#allocation3], %s147_s22 }
   0xf   : > { %s570_s5 = scalar_lea.hbm %s703_s27, 128  ;;  %s575_s8 = scalar_lea.hbm %s822_s1, 256 }
  0x10   : > { %p571_p11 = scmp.ne.s32.totalorder %s703_s27, %s570_s5  ;;  %p572_p12 = pneg %p707_p8 }
  0x11   : > { %p576_p1 = scmp.lt.s32.totalorder %s703_s27, %s822_s1  ;;  %p577_p2 = scmp.lt.s32.totalorder %s575_s8, %s570_s5 }
  0x12   : > { %p573_p13 = pnand %p572_p12, %p571_p11 }
  0x13   : > { %p578_p3 = por %p577_p2, %p576_p1 }
  0x14   : > { %p574_p0 = pneg %p573_p13 }
  0x16   : > { %p579_p4 = pnand %p578_p3, %p574_p0 }
  0x18   : > { %582 = shalt.err (!%p579_p4)
}
  0x19   : > { %s583_s11 = scalar_lea.vmem %s705_s29, 128  ;;  %s634_s12 = smov [#allocation2]  }
  0x1a   : > { %p584_p5 = scmp.ne.s32.totalorder %s705_s29, %s583_s11  ;;  %s588_s18 = sshll.u32 %s634_s12, 4  ;;  %s589_s18 = int_to_ptr.vmem [resolvable:$false] %s588_s18 }
  0x1b   : > { %s590_s19 = scalar_lea.vmem %s589_s18, 256  ;;  %p591_p13 = scmp.lt.s32.totalorder %s705_s29, %s589_s18 }
  0x1c   : > { %p586_p6 = pnand %p584_p5, %p572_p12  ;;  %p592_p9 = scmp.lt.s32.totalorder %s590_s19, %s583_s11 }
  0x1e   : > { %p587_p11 = pneg %p586_p6  ;;  %p593_p10 = por %p592_p9, %p591_p13 }
  0x20   : > { %p594_p7 = pnand %p593_p10, %p587_p11 }
  0x22   : > { %597 = shalt.err (!%p594_p7)
}
  0x23   : > { %524 = dma.hbm_to_vmem [thread:$0]  (!%p707_p8), %s703_s27, 128, %s705_s29, %s148_s4  }
  0x24   : > { %p828_p0 = scmp.lt.s32.totalorder %s632_s15, 3  ;;  %p829_p1 = scmp.ge.s32.totalorder %s632_s15, 1 }
  0x26   : > { %p173_p12 = pnand %p829_p1, %p828_p0 }
  0x27   : > { %s178_s22 = sand.u32 (!%p173_p12), 1, %s624_s13   ;;  %p830_p9 = scmp.ne.s32.totalorder (!%p173_p12), %s826_s21, 0 }
  0x28   : > { %176 = sbr.rel (%p173_p12) target bundleno = 453 (0x1c5), region = 32  ;;  %s506_s23 = sshll.u32 (!%p173_p12), %s178_s22, 3 }
  0x29   : > { %s179_s24 = scalar_lea.sflag (!%p173_p12), [#allocation3], %s178_s22  ;;  %s182_s25 = scalar_lea.vmem (!%p173_p12), [#allocation2], %s506_s23 }
  0x2d   : > { %615 = dma.done.wait (%p830_p9), %s179_s24, 128  }
  0x2e   : > { %617 = vsyncadd (%p830_p9), %s179_s24, 4294967168  ;;  %s507_s26 = sshll.u32 %s499_s16, 2  ;;  %v237_v0 = vld [vmem:[%s182_s25] sm:$0xff]  ;;  %s635_s15 = smov 127   ;;  %vm398_vm0 = vcmask 7168   ;;  %vm403_vm1 = vcmask 15360  }
  0x2f   : > { %p216_p7 = scmp.lt.s32.totalorder %s507_s26, 7  ;;  %v240_v1 = vunpack.c.2.s8 %v237_v0  ;;  %v238_v3 = vunpack.c.0.s8 %v237_v0  ;;  %v241_v4 = vunpack.c.3.s8 %v237_v0  ;;  %v239_v7 = vunpack.c.1.s8 %v237_v0  ;;  %s636_s16 = smov 2  }
  0x30   : > { %s637_s21 = smov 1   ;;  %s638_s7 = smov 126  }
  0x31   : > { %s836_s26 = smov (!%p216_p7, %s507_s26), 7  ;;  %v244_v8 = vcvt.s32.f32 %v240_v1  ;;  %v242_v9 = vcvt.s32.f32 %v238_v3  ;;  %v245_v10 = vcvt.s32.f32 %v241_v4  ;;  %v243_v14 = vcvt.s32.f32 %v239_v7 }
  0x32   : > { %s742_s27 = sshll.u32 %s836_s26, 3 }
  0x33   : > { %s219_s30 = scalar_lea.vmem %s821_s0, %s742_s27  ;;  %s225_s6 = scalar_lea.vmem %s823_s2, %s742_s27 }
  0x34   : > { %v752_v2 = vld [vmem:[%s225_s6 + $0x8] sm:$0xff]  ;;  %v235_v5 = vld [vmem:[%s219_s30 + $0x10] sm:$0xff]  ;;  %v233_v6 = vld [vmem:[%s219_s30] sm:$0xff]  ;;  %s231_s10 = scalar_lea.vmem %s824_s3, %s742_s27 }
  0x35   : > { %v267_v11 = vsub.f32 0.0, %v752_v2  ;;  %v236_v12 = vld [vmem:[%s219_s30 + $0x18] sm:$0xff]  ;;  %v234_v13 = vld [vmem:[%s219_s30 + $0x8] sm:$0xff]  ;;  %v755_v15 = vld [vmem:[%s225_s6 + $0x10] sm:$0xff]  ;;  %v252_v16 = vmul.f32 %v244_v8, %v235_v5  ;;  %v250_v17 = vmul.f32 %v242_v9, %v233_v6  ;;  %v514_v52 = vadd.f32 0.0049, %v752_v2 }
  0x36   : > { %v757_v18 = vld [vmem:[%s225_s6] sm:$0xff]  ;;  %v253_v19 = vmul.f32 %v245_v10, %v236_v12  ;;  %v251_v20 = vmul.f32 %v243_v14, %v234_v13  ;;  %v268_v21 = vsub.f32 0.0, %v755_v15  ;;  %v762_v23 = vld [vmem:[%s225_s6 + $0x18] sm:$0xff]  ;;  %v515_v53 = vadd.f32 0.0049, %v755_v15 }
  0x37   : > { %258 = vadd.xlane.f32.xlu1 %v252_v16  ;;  %254 = vadd.xlane.f32.xlu0 %v250_v17  ;;  %v292_v22 = vmul.f32 1.442695, %v267_v11  ;;  %v266_v24 = vsub.f32 0.0, %v757_v18  ;;  %v269_v25 = vsub.f32 0.0, %v762_v23  ;;  %v513_v49 = vadd.f32 0.0049, %v757_v18 }
  0x38   : > { %v294_v26 = vmul.f32 1.442695, %v268_v21  ;;  %v343_v55 = vmul.f32 %v514_v52, %v514_v52  ;;  %v344_v57 = vmul.f32 %v515_v53, %v515_v53  ;;  %v516_v58 = vadd.f32 0.0049, %v762_v23 }
  0x39   : > { %562 = vpow2.f32 %v292_v22  ;;  %v290_v27 = vmul.f32 1.442695, %v266_v24  ;;  %v296_v28 = vmul.f32 1.442695, %v269_v25  ;;  %v342_v51 = vmul.f32 %v513_v49, %v513_v49 }
  0x3a   : > { %564 = vpow2.f32 %v294_v26  ;;  %v347_v61 = vmul.f32 0.5, %v343_v55  ;;  %v348_v62 = vmul.f32 0.5, %v344_v57  ;;  %v345_v63 = vmul.f32 %v516_v58, %v516_v58 }
  0x3b   : > { %260 = vadd.xlane.f32.xlu1 %v253_v19  ;;  %256 = vadd.xlane.f32.xlu0 %v251_v20  ;;  %566 = vpow2.f32 %v290_v27  ;;  %v346_v54 = vmul.f32 0.5, %v342_v51 }
  0x3c   : > { %568 = vpow2.f32 %v296_v28  ;;  %v351_v4 = vmul.f32 0.2167362, %v347_v61  ;;  %v352_v6 = vmul.f32 0.2167362, %v348_v62  ;;  %v349_v8 = vmul.f32 0.5, %v345_v63 }
  0x3d   : > { %v350_v60 = vmul.f32 0.2167362, %v346_v54 }
  0x3e   : > { %v355_v13 = vsub.f32 -1.6834757, %v351_v4  ;;  %v356_v16 = vsub.f32 -1.6834757, %v352_v6 }
  0x3f   : > { %v354_v3 = vsub.f32 -1.6834757, %v350_v60 }
  0x46   : > { %v563_v29 = vpop.eup %562 }
  0x47   : > { %v565_v30 = vpop.eup %564 }
  0x48   : > { %v567_v31 = vpop.eup %566 }
  0x49   : > { %v569_v32 = vpop.eup %568 }
  0x4c   : > { %304 = vrot.lane.b32.xlu1 %v563_v29, %s635_s15 }
  0x50   : > { %306 = vrot.lane.b32.xlu1 %v565_v30, %s635_s15 }
  0x51   : > { %302 = vrot.lane.b32.xlu0 %v567_v31, %s635_s15 }
  0x54   : > { %308 = vrot.lane.b32.xlu1 %v569_v32, %s635_s15 }
  0x55   : > { %274 = vrot.lane.b32.xlu0 %v757_v18, %s636_s16 }
  0x58   : > { %276 = vrot.lane.b32.xlu1 %v752_v2, %s636_s16 }
  0x59   : > { %278 = vrot.lane.b32.xlu0 %v755_v15, %s636_s16 }
  0x5d   : > { %280 = vrot.lane.b32.xlu0 %v762_v23, %s636_s16 }
  0xc0   : > { %v259_v33 = vpop.xlane.xlu1 %258  ;;  %v255_v34 = vpop.xlane.xlu0 %254 }
  0xc1   : > { %v262_v37 = vadd.f32 %v255_v34, %v757_v18  ;;  %v264_v41 = vadd.f32 %v259_v33, %v755_v15 }
  0xc4   : > { %v261_v35 = vpop.xlane.xlu1 %260  ;;  %v257_v36 = vpop.xlane.xlu0 %256 }
  0xc5   : > { %v263_v42 = vadd.f32 %v257_v36, %v752_v2  ;;  %v265_v46 = vadd.f32 %v261_v35, %v762_v23 }
  0xc8   : > { %v305_v38 = vpop.permute.xlu1 %304  ;;  %v303_v39 = vpop.permute.xlu0 %302 }
  0xc9   : > { %v314_v40 = vmul.f32 %v303_v39, %v262_v37  ;;  %v315_v44 = vmul.f32 %v305_v38, %v263_v42 }
  0xcb   : > { %322 = vrot.lane.b32.xlu1 %v314_v40, %s637_s21 }
  0xcc   : > { %v307_v43 = vpop.permute.xlu1 %306  ;;  %v275_v50 = vpop.permute.xlu0 %274 }
  0xcd   : > { %v316_v45 = vmul.f32 %v307_v43, %v264_v41  ;;  %v286_v1 = vmul.f32 %v275_v50, %v266_v24  ;;  %v353_v24 = vmul.f32 0.2167362, %v349_v8 }
  0xcf   : > { %326 = vrot.lane.b32.xlu0 %v316_v45, %s637_s21  ;;  %324 = vrot.lane.b32.xlu1 %v315_v44, %s637_s21  ;;  %v357_v28 = vsub.f32 -1.6834757, %v353_v24 }
  0xd0   : > { %v309_v47 = vpop.permute.xlu1 %308  ;;  %v279_v56 = vpop.permute.xlu0 %278 }
  0xd1   : > { %v317_v48 = vmul.f32 %v309_v47, %v265_v46  ;;  %v288_v10 = vmul.f32 %v279_v56, %v268_v21 }
  0xd3   : > { %328 = vrot.lane.b32.xlu1 %v317_v48, %s637_s21 }
  0xd4   : > { %v277_v59 = vpop.permute.xlu1 %276  ;;  %v281_v0 = vpop.permute.xlu0 %280 }
  0xd5   : > { %v287_v9 = vmul.f32 %v277_v59, %v267_v11  ;;  %v289_v26 = vmul.f32 %v281_v0, %v269_v25 }
 0x13d   : > { %v323_v5 = vpop.permute.xlu1 %322 }
 0x13e   : > { %v334_v7 = vsub.f32 %v286_v1, %v323_v5 }
 0x140   : > { %v358_v12 = vadd.f32 %v354_v3, %v334_v7 }
 0x141   : > { %v325_v14 = vpop.permute.xlu1 %324  ;;  %v327_v17 = vpop.permute.xlu0 %326 }
 0x142   : > { %v335_v19 = vsub.f32 %v287_v9, %v325_v14  ;;  %v336_v20 = vsub.f32 %v288_v10, %v327_v17  ;;  %370 = vrot.lane.b32.xlu0 %v358_v12, %s638_s7  ;;  %v362_v22 = vsub.f32 %v358_v12, %v757_v18 }
 0x144   : > { %v359_v27 = vadd.f32 %v355_v13, %v335_v19  ;;  %386 = vrot.lane.b32.xlu1 %v362_v22, %s635_s15  ;;  %v360_v21 = vadd.f32 %v356_v16, %v336_v20 }
 0x145   : > { %v329_v11 = vpop.permute.xlu1 %328 }
 0x146   : > { %v337_v29 = vsub.f32 %v289_v26, %v329_v11  ;;  %372 = vrot.lane.b32.xlu0 %v359_v27, %s638_s7  ;;  %v363_v30 = vsub.f32 %v359_v27, %v752_v2  ;;  %v364_v18 = vsub.f32 %v360_v21, %v755_v15 }
 0x148   : > { %388 = vrot.lane.b32.xlu1 %v363_v30, %s635_s15  ;;  %v361_v31 = vadd.f32 %v357_v28, %v337_v29 }
 0x14a   : > { %374 = vrot.lane.b32.xlu0 %v360_v21, %s638_s7  ;;  %v365_v25 = vsub.f32 %v361_v31, %v762_v23 }
 0x14c   : > { %390 = vrot.lane.b32.xlu1 %v364_v18, %s635_s15 }
 0x14e   : > { %376 = vrot.lane.b32.xlu0 %v361_v31, %s638_s7 }
 0x150   : > { %392 = vrot.lane.b32.xlu1 %v365_v25, %s635_s15 }
 0x1b4   : > { %v371_v32 = vpop.permute.xlu0 %370 }
 0x1b6   : > { %v387_v2 = vpop.permute.xlu1 %386 }
 0x1b7   : > { %v399_v33 = vsel %vm398_vm0, %v371_v32, %v387_v2 }
 0x1b8   : > { %404 = vst.msk [vmem:[%s231_s10] sm:$0xff] %vm403_vm1, %v399_v33  ;;  %v373_v34 = vpop.permute.xlu0 %372 }
 0x1ba   : > { %v389_v15 = vpop.permute.xlu1 %388 }
 0x1bb   : > { %v400_v35 = vsel %vm398_vm0, %v373_v34, %v389_v15 }
 0x1bc   : > { %405 = vst.msk [vmem:[%s231_s10 + $0x8] sm:$0xff] %vm403_vm1, %v400_v35  ;;  %v375_v36 = vpop.permute.xlu0 %374 }
 0x1be   : > { %v391_v23 = vpop.permute.xlu1 %390 }
 0x1bf   : > { %v401_v37 = vsel %vm398_vm0, %v375_v36, %v391_v23 }
 0x1c0   : > { %406 = vst.msk [vmem:[%s231_s10 + $0x10] sm:$0xff] %vm403_vm1, %v401_v37  ;;  %v377_v38 = vpop.permute.xlu0 %376 }
 0x1c2   : > { %v393_v39 = vpop.permute.xlu1 %392 }
 0x1c3   : > { %v402_v40 = vsel %vm398_vm0, %v377_v38, %v393_v39 }
 0x1c4   : > { %407 = vst.msk [vmem:[%s231_s10 + $0x18] sm:$0xff] %vm403_vm1, %v402_v40 }
 0x1c5 PF: > { %p13_p8 = scmp.ge.s32.totalorder %s679_s17, 4   ;;  %s831_s12 = smov %s624_s13 }
 0x1c6   : > { %s832_s13 = smov %s628_s14  ;;  %s833_s14 = smov %s689_s20 }
 0x1c7   : > { %s834_s15 = smov %s679_s17  ;;  %15 = sbr.rel (!%p13_p8) target bundleno = 3 (0x3), region = 78 }
 0x1cc   :  { %430 = vsyncpa [#allocation3], 1 }
 0x1cd   :  { %432 = vsyncpa [#allocation3 + $0x1], 1 }

</bundles_post_ra>
